<compile_context>
chip_gen: v6e
topology: v6e:2x2x1
jax: 0.10.0
libtpu: 0.0.40
codegen_flags: <defaults>
</compile_context>

<pallas_src>
import functools
from collections import defaultdict

import numpy as np
import jax
import jax.numpy as jnp
from jax.experimental import pallas as pl
from jax.experimental.pallas import tpu as pltpu


# ---------------------------------------------------------------------------
# Static DAG plumbing (host-side, mirrors the PyTorch Graph class)
# ---------------------------------------------------------------------------

class _Graph:
    def __init__(self, vertices):
        self.graph = defaultdict(list)
        self.V = vertices

    def addEdge(self, u, v):
        self.graph[u].append(v)

    def _util(self, v, visited, stack):
        visited[v] = True
        for i in self.graph[v]:
            if not visited[i]:
                self._util(i, visited, stack)
        stack.insert(0, v)

    def topologicalSort(self):
        visited = [False] * self.V
        stack = []
        for i in range(self.V):
            if not visited[i]:
                self._util(i, visited, stack)
        return stack


# ---------------------------------------------------------------------------
# Fused Pallas kernel: entire DAG_Generator forward in one launch
# ---------------------------------------------------------------------------

def _dag_forward_kernel(c_ref, d_ref, n_ref, nd_ref, cw_ref, mu_ref, sg_ref,
                        w1c_ref, w1d_ref, w1z_ref, w1p_ref, b1_ref, w2_ref, b2_ref,
                        out_ref, *, node_order, parents, cl_dim, do_dim, z_dim):
    f32 = jnp.float32

    # inputs_c = cnet(input_c)             (B, cl_dim*i_dim)
    inputs_c = jnp.dot(c_ref[...], cw_ref[...], preferred_element_type=f32)
    # theta = mu + log(1+exp(sigma)) * noise_d ; inputs_d = input_d @ theta
    theta = mu_ref[...] + jnp.log(1.0 + jnp.exp(sg_ref[...])) * nd_ref[...]
    inputs_d = jnp.dot(d_ref[...], theta, preferred_element_type=f32)
    noise = n_ref[...]                      # (B, z_dim*i_dim)

    i_dim = len(node_order)
    vals = [None] * i_dim                   # DAG state carried in registers

    # Static unroll over nodes in topological order; the DAG dependency flows only
    # through the register-carried `vals` list (no per-node ref traffic).
    for i in node_order:
        ci = inputs_c[:, i * cl_dim:(i + 1) * cl_dim]
        di = inputs_d[:, i * do_dim:(i + 1) * do_dim]
        ni = noise[:, i * z_dim:(i + 1) * z_dim]
        pre = (jnp.dot(ci, w1c_ref[i], preferred_element_type=f32)
               + jnp.dot(di, w1d_ref[i], preferred_element_type=f32)
               + jnp.dot(ni, w1z_ref[i], preferred_element_type=f32)
               + b1_ref[i:i + 1, :])
        if len(parents[i]) > 0:
            w1p_i = w1p_ref[i]                                # (i_dim, H), static slice
            for par in parents[i]:
                # parent gather as a per-parent rank-1 VPU update (no MXU pass needed)
                pre = pre + vals[par] * w1p_i[par:par + 1, :]
        h = jnp.maximum(pre, 0.0)                                      # ReLU
        val = jnp.sum(h * w2_ref[i:i + 1, :], axis=1, keepdims=True)   # Linear(H -> 1)
        vals[i] = val + b2_ref[:, i:i + 1]

    # Single store of the whole output slab (column j == node j).
    out_ref[...] = jnp.concatenate(vals, axis=1)


def make_dag_generator(i_dim, cl_num, do_num, cl_dim, do_dim, z_dim, dagMat,
                       num_nodes=64, num_layer=1):
    """Builds the static DAG structure and returns a jitted fused forward fn."""
    assert num_layer == 1, "only the default num_layer=1 architecture is implemented"
    dagMat = np.asarray(dagMat)

    dag = _Graph(i_dim)
    for i in range(i_dim):
        for j in range(i_dim):
            if dagMat[j, i]:
                dag.addEdge(i, j)
    node_order = tuple(int(v) for v in dag.topologicalSort())

    dag_core = dagMat[:, :-2]               # drop yd_sign columns (unused in forward)
    parents = tuple(tuple(int(j) for j in np.flatnonzero(dag_core[i, :]))
                    for i in range(i_dim))

    # Sanity: every parent must precede its child in the topological order.
    pos = {n: k for k, n in enumerate(node_order)}
    for i in range(i_dim):
        for par in parents[i]:
            assert pos[par] < pos[i], (i, par, node_order)

    kernel = functools.partial(_dag_forward_kernel,
                               node_order=node_order, parents=parents,
                               cl_dim=cl_dim, do_dim=do_dim, z_dim=z_dim)
    vmem = pl.BlockSpec(memory_space=pltpu.MemorySpace.VMEM)

    @jax.jit
    def forward(params, noise, input_c, input_d, noise_d):
        B = input_c.shape[0]
        return pl.pallas_call(
            kernel,
            out_shape=jax.ShapeDtypeStruct((B, i_dim), jnp.float32),
            in_specs=[vmem] * 14,
            out_specs=vmem,
        )(input_c, input_d, noise, noise_d,
          params["cnet_w"], params["mu"], params["sigma"],
          params["w1c"], params["w1d"], params["w1z"], params["w1p"],
          params["b1"], params["w2"], params["b2"])

    return forward, node_order, parents


# ---------------------------------------------------------------------------
# Parameter construction (weights stored pre-laid-out as (in, out) stacks)
# ---------------------------------------------------------------------------

def init_params(key, i_dim, cl_num, do_num, cl_dim, do_dim, z_dim, H):
    ks = jax.random.split(key, 10)
    nrm = jax.random.normal
    p = {}
    p["cnet_w"] = 0.3 * nrm(ks[0], (cl_num, cl_dim * i_dim), jnp.float32)   # cnet.weight.T
    p["mu"] = 0.1 * nrm(ks[1], (do_num, do_dim * i_dim), jnp.float32)
    p["sigma"] = 0.1 * nrm(ks[2], (do_num, do_dim * i_dim), jnp.float32)
    p["w1c"] = 0.3 * nrm(ks[3], (i_dim, cl_dim, H), jnp.float32)
    p["w1d"] = 0.3 * nrm(ks[4], (i_dim, do_dim, H), jnp.float32)
    p["w1z"] = 0.3 * nrm(ks[5], (i_dim, z_dim, H), jnp.float32)
    # per-node parent weights; only rows belonging to actual parents are ever read
    p["w1p"] = 0.3 * nrm(ks[6], (i_dim, i_dim, H), jnp.float32)
    p["b1"] = 0.1 * nrm(ks[7], (i_dim, H), jnp.float32)
    p["w2"] = 0.3 * nrm(ks[8], (i_dim, H), jnp.float32)
    p["b2"] = 0.1 * nrm(ks[9], (1, i_dim), jnp.float32)
    return p


# ---------------------------------------------------------------------------
# Pure-JAX reference (mirrors the PyTorch concat/gather-based loop)
# ---------------------------------------------------------------------------

def reference_forward(params, noise, input_c, input_d, noise_d,
                      node_order, parents, i_dim, cl_dim, do_dim, z_dim):
    hp = jax.lax.Precision.HIGHEST
    inputs_c = jnp.dot(input_c, params["cnet_w"], precision=hp)
    theta = params["mu"] + jnp.log(1.0 + jnp.exp(params["sigma"])) * noise_d
    inputs_d = jnp.dot(input_d, theta, precision=hp)
    B = input_c.shape[0]
    out = jnp.zeros((B, i_dim), jnp.float32)
    for i in node_order:
        ci = inputs_c[:, i * cl_dim:(i + 1) * cl_dim]
        di = inputs_d[:, i * do_dim:(i + 1) * do_dim]
        ni = noise[:, i * z_dim:(i + 1) * z_dim]
        feats = [ci, di, ni]
        wparts = [params["w1c"][i], params["w1d"][i], params["w1z"][i]]
        if parents[i]:
            idx = list(parents[i])
            feats.append(out[:, idx])
            wparts.append(params["w1p"][i][idx, :])
        x = jnp.concatenate(feats, axis=1)
        W1 = jnp.concatenate(wparts, axis=0)
        h = jax.nn.relu(jnp.dot(x, W1, precision=hp) + params["b1"][i])
        val = jnp.dot(h, params["w2"][i], precision=hp) + params["b2"][0, i]
        out = out.at[:, i].set(val)
    return out


# ---------------------------------------------------------------------------

if __name__ == "__main__":
    key = jax.random.PRNGKey(0)
    B, i_dim = 2, 6
    cl_num, do_num = 4, 3
    cl_dim, do_dim, z_dim = 2, 2, 4
    H = 64                      # num_nodes (module default)

    # dagMat[i, j] = 1  ->  node j is a parent of node i; last 2 cols = yd_sign (unused).
    dagMat = np.zeros((i_dim, i_dim + 2), dtype=np.int64)
    edges = {1: [0], 2: [0, 1], 3: [1], 4: [2, 3], 5: [0, 4]}
    for child, ps in edges.items():
        for par in ps:
            dagMat[child, par] = 1

    forward, node_order, parents = make_dag_generator(
        i_dim, cl_num, do_num, cl_dim, do_dim, z_dim, dagMat, num_nodes=H, num_layer=1)

    kp, kn, kc, kd, knd = jax.random.split(key, 5)
    params = init_params(kp, i_dim, cl_num, do_num, cl_dim, do_dim, z_dim, H)
    noise = jax.random.normal(kn, (B, z_dim * i_dim), jnp.float32)
    input_c = jax.random.normal(kc, (B, cl_num), jnp.float32)
    input_d = jax.random.normal(kd, (B, do_num), jnp.float32)
    noise_d = jax.random.normal(knd, (do_num, do_dim * i_dim), jnp.float32)

    out = forward(params, noise, input_c, input_d, noise_d)
    jax.block_until_ready(out)
    assert out.shape == (B, i_dim), out.shape

    ref = reference_forward(params, noise, input_c, input_d, noise_d,
                            node_order, parents, i_dim, cl_dim, do_dim, z_dim)
    assert jnp.allclose(out, ref, atol=1e-3, rtol=1e-3), (out, ref)
    print("KERNEL_OK")
</pallas_src>

<mosaic_0001>
module attributes {stable_mosaic.version = 11 : i64} {
  func.func @_dag_forward_kernel(%arg0: memref<2x4xf32, #tpu.memory_space<vmem>>, %arg1: memref<2x3xf32, #tpu.memory_space<vmem>>, %arg2: memref<2x24xf32, #tpu.memory_space<vmem>>, %arg3: memref<3x12xf32, #tpu.memory_space<vmem>>, %arg4: memref<4x12xf32, #tpu.memory_space<vmem>>, %arg5: memref<3x12xf32, #tpu.memory_space<vmem>>, %arg6: memref<3x12xf32, #tpu.memory_space<vmem>>, %arg7: memref<6x2x64xf32, #tpu.memory_space<vmem>>, %arg8: memref<6x2x64xf32, #tpu.memory_space<vmem>>, %arg9: memref<6x4x64xf32, #tpu.memory_space<vmem>>, %arg10: memref<6x6x64xf32, #tpu.memory_space<vmem>>, %arg11: memref<6x64xf32, #tpu.memory_space<vmem>>, %arg12: memref<6x64xf32, #tpu.memory_space<vmem>>, %arg13: memref<1x6xf32, #tpu.memory_space<vmem>>, %arg14: memref<2x6xf32, #tpu.memory_space<vmem>>) attributes {dimension_semantics = [], scalar_prefetch = 0 : i64, scratch_operands = 0 : i64, tpu.core_type = #tpu.core_type<tc>} {
    %c0 = arith.constant 0 : index
    %c0_0 = arith.constant 0 : index
    %0 = vector.load %arg0[%c0, %c0_0] : memref<2x4xf32, #tpu.memory_space<vmem>>, vector<2x4xf32>
    %c0_1 = arith.constant 0 : index
    %c0_2 = arith.constant 0 : index
    %1 = vector.load %arg4[%c0_1, %c0_2] : memref<4x12xf32, #tpu.memory_space<vmem>>, vector<4x12xf32>
    %cst = arith.constant dense<0.000000e+00> : vector<2x12xf32>
    %2 = tpu.matmul %0, %1, %cst {dimension_numbers = #tpu.dot_dimension_numbers<[1], [0], [0], [1], [0, 0, 1, 1], [], []>} : vector<2x4xf32>, vector<4x12xf32>, vector<2x12xf32> -> vector<2x12xf32>
    %c0_3 = arith.constant 0 : index
    %c0_4 = arith.constant 0 : index
    %3 = vector.load %arg5[%c0_3, %c0_4] : memref<3x12xf32, #tpu.memory_space<vmem>>, vector<3x12xf32>
    %c0_5 = arith.constant 0 : index
    %c0_6 = arith.constant 0 : index
    %4 = vector.load %arg6[%c0_5, %c0_6] : memref<3x12xf32, #tpu.memory_space<vmem>>, vector<3x12xf32>
    %5 = math.exp %4 : vector<3x12xf32>
    %cst_7 = arith.constant 1.000000e+00 : f32
    %6 = vector.broadcast %cst_7 : f32 to vector<3x12xf32>
    %7 = arith.addf %6, %5 : vector<3x12xf32>
    %8 = math.log %7 : vector<3x12xf32>
    %c0_8 = arith.constant 0 : index
    %c0_9 = arith.constant 0 : index
    %9 = vector.load %arg3[%c0_8, %c0_9] : memref<3x12xf32, #tpu.memory_space<vmem>>, vector<3x12xf32>
    %10 = arith.mulf %8, %9 : vector<3x12xf32>
    %11 = arith.addf %3, %10 : vector<3x12xf32>
    %c0_10 = arith.constant 0 : index
    %c0_11 = arith.constant 0 : index
    %12 = vector.load %arg1[%c0_10, %c0_11] : memref<2x3xf32, #tpu.memory_space<vmem>>, vector<2x3xf32>
    %cst_12 = arith.constant dense<0.000000e+00> : vector<2x12xf32>
    %13 = tpu.matmul %12, %11, %cst_12 {dimension_numbers = #tpu.dot_dimension_numbers<[1], [0], [0], [1], [0, 0, 1, 1], [], []>} : vector<2x3xf32>, vector<3x12xf32>, vector<2x12xf32> -> vector<2x12xf32>
    %c0_13 = arith.constant 0 : index
    %c0_14 = arith.constant 0 : index
    %14 = vector.load %arg2[%c0_13, %c0_14] : memref<2x24xf32, #tpu.memory_space<vmem>>, vector<2x24xf32>
    %15 = vector.extract_strided_slice %2 {offsets = [0, 0], sizes = [2, 2], strides = [1, 1]} : vector<2x12xf32> to vector<2x2xf32>
    %16 = vector.extract_strided_slice %13 {offsets = [0, 0], sizes = [2, 2], strides = [1, 1]} : vector<2x12xf32> to vector<2x2xf32>
    %17 = vector.extract_strided_slice %14 {offsets = [0, 0], sizes = [2, 4], strides = [1, 1]} : vector<2x24xf32> to vector<2x4xf32>
    %c0_15 = arith.constant 0 : index
    %c0_16 = arith.constant 0 : index
    %c0_17 = arith.constant 0 : index
    %18 = vector.load %arg7[%c0_15, %c0_16, %c0_17] : memref<6x2x64xf32, #tpu.memory_space<vmem>>, vector<1x2x64xf32>
    %19 = vector.shape_cast %18 : vector<1x2x64xf32> to vector<2x64xf32>
    %cst_18 = arith.constant dense<0.000000e+00> : vector<2x64xf32>
    %20 = tpu.matmul %15, %19, %cst_18 {dimension_numbers = #tpu.dot_dimension_numbers<[1], [0], [0], [1], [0, 0, 1, 1], [], []>} : vector<2x2xf32>, vector<2x64xf32>, vector<2x64xf32> -> vector<2x64xf32>
    %c0_19 = arith.constant 0 : index
    %c0_20 = arith.constant 0 : index
    %c0_21 = arith.constant 0 : index
    %21 = vector.load %arg8[%c0_19, %c0_20, %c0_21] : memref<6x2x64xf32, #tpu.memory_space<vmem>>, vector<1x2x64xf32>
    %22 = vector.shape_cast %21 : vector<1x2x64xf32> to vector<2x64xf32>
    %cst_22 = arith.constant dense<0.000000e+00> : vector<2x64xf32>
    %23 = tpu.matmul %16, %22, %cst_22 {dimension_numbers = #tpu.dot_dimension_numbers<[1], [0], [0], [1], [0, 0, 1, 1], [], []>} : vector<2x2xf32>, vector<2x64xf32>, vector<2x64xf32> -> vector<2x64xf32>
    %24 = arith.addf %20, %23 : vector<2x64xf32>
    %c0_23 = arith.constant 0 : index
    %c0_24 = arith.constant 0 : index
    %c0_25 = arith.constant 0 : index
    %25 = vector.load %arg9[%c0_23, %c0_24, %c0_25] : memref<6x4x64xf32, #tpu.memory_space<vmem>>, vector<1x4x64xf32>
    %26 = vector.shape_cast %25 : vector<1x4x64xf32> to vector<4x64xf32>
    %cst_26 = arith.constant dense<0.000000e+00> : vector<2x64xf32>
    %27 = tpu.matmul %17, %26, %cst_26 {dimension_numbers = #tpu.dot_dimension_numbers<[1], [0], [0], [1], [0, 0, 1, 1], [], []>} : vector<2x4xf32>, vector<4x64xf32>, vector<2x64xf32> -> vector<2x64xf32>
    %28 = arith.addf %24, %27 : vector<2x64xf32>
    %c0_27 = arith.constant 0 : index
    %c0_28 = arith.constant 0 : index
    %29 = vector.load %arg11[%c0_27, %c0_28] : memref<6x64xf32, #tpu.memory_space<vmem>>, vector<1x64xf32>
    %30 = vector.broadcast %29 : vector<1x64xf32> to vector<2x64xf32>
    %31 = arith.addf %28, %30 : vector<2x64xf32>
    %cst_29 = arith.constant 0.000000e+00 : f32
    %32 = vector.broadcast %cst_29 : f32 to vector<2x64xf32>
    %33 = arith.maximumf %31, %32 : vector<2x64xf32>
    %c0_30 = arith.constant 0 : index
    %c0_31 = arith.constant 0 : index
    %34 = vector.load %arg12[%c0_30, %c0_31] : memref<6x64xf32, #tpu.memory_space<vmem>>, vector<1x64xf32>
    %35 = vector.broadcast %34 : vector<1x64xf32> to vector<2x64xf32>
    %36 = arith.mulf %33, %35 : vector<2x64xf32>
    %cst_32 = arith.constant dense<0.000000e+00> : vector<2xf32>
    %37 = vector.multi_reduction <add>, %36, %cst_32 [1] : vector<2x64xf32> to vector<2xf32>
    %38 = vector.shape_cast %37 : vector<2xf32> to vector<2x1xf32>
    %c0_33 = arith.constant 0 : index
    %c0_34 = arith.constant 0 : index
    %39 = vector.load %arg13[%c0_33, %c0_34] : memref<1x6xf32, #tpu.memory_space<vmem>>, vector<1x1xf32>
    %40 = vector.broadcast %39 : vector<1x1xf32> to vector<2x1xf32>
    %41 = arith.addf %38, %40 : vector<2x1xf32>
    %42 = vector.extract_strided_slice %2 {offsets = [0, 2], sizes = [2, 2], strides = [1, 1]} : vector<2x12xf32> to vector<2x2xf32>
    %43 = vector.extract_strided_slice %13 {offsets = [0, 2], sizes = [2, 2], strides = [1, 1]} : vector<2x12xf32> to vector<2x2xf32>
    %44 = vector.extract_strided_slice %14 {offsets = [0, 4], sizes = [2, 4], strides = [1, 1]} : vector<2x24xf32> to vector<2x4xf32>
    %c1 = arith.constant 1 : index
    %c0_35 = arith.constant 0 : index
    %c0_36 = arith.constant 0 : index
    %45 = vector.load %arg7[%c1, %c0_35, %c0_36] : memref<6x2x64xf32, #tpu.memory_space<vmem>>, vector<1x2x64xf32>
    %46 = vector.shape_cast %45 : vector<1x2x64xf32> to vector<2x64xf32>
    %cst_37 = arith.constant dense<0.000000e+00> : vector<2x64xf32>
    %47 = tpu.matmul %42, %46, %cst_37 {dimension_numbers = #tpu.dot_dimension_numbers<[1], [0], [0], [1], [0, 0, 1, 1], [], []>} : vector<2x2xf32>, vector<2x64xf32>, vector<2x64xf32> -> vector<2x64xf32>
    %c1_38 = arith.constant 1 : index
    %c0_39 = arith.constant 0 : index
    %c0_40 = arith.constant 0 : index
    %48 = vector.load %arg8[%c1_38, %c0_39, %c0_40] : memref<6x2x64xf32, #tpu.memory_space<vmem>>, vector<1x2x64xf32>
    %49 = vector.shape_cast %48 : vector<1x2x64xf32> to vector<2x64xf32>
    %cst_41 = arith.constant dense<0.000000e+00> : vector<2x64xf32>
    %50 = tpu.matmul %43, %49, %cst_41 {dimension_numbers = #tpu.dot_dimension_numbers<[1], [0], [0], [1], [0, 0, 1, 1], [], []>} : vector<2x2xf32>, vector<2x64xf32>, vector<2x64xf32> -> vector<2x64xf32>
    %51 = arith.addf %47, %50 : vector<2x64xf32>
    %c1_42 = arith.constant 1 : index
    %c0_43 = arith.constant 0 : index
    %c0_44 = arith.constant 0 : index
    %52 = vector.load %arg9[%c1_42, %c0_43, %c0_44] : memref<6x4x64xf32, #tpu.memory_space<vmem>>, vector<1x4x64xf32>
    %53 = vector.shape_cast %52 : vector<1x4x64xf32> to vector<4x64xf32>
    %cst_45 = arith.constant dense<0.000000e+00> : vector<2x64xf32>
    %54 = tpu.matmul %44, %53, %cst_45 {dimension_numbers = #tpu.dot_dimension_numbers<[1], [0], [0], [1], [0, 0, 1, 1], [], []>} : vector<2x4xf32>, vector<4x64xf32>, vector<2x64xf32> -> vector<2x64xf32>
    %55 = arith.addf %51, %54 : vector<2x64xf32>
    %c1_46 = arith.constant 1 : index
    %c0_47 = arith.constant 0 : index
    %56 = vector.load %arg11[%c1_46, %c0_47] : memref<6x64xf32, #tpu.memory_space<vmem>>, vector<1x64xf32>
    %57 = vector.broadcast %56 : vector<1x64xf32> to vector<2x64xf32>
    %58 = arith.addf %55, %57 : vector<2x64xf32>
    %c1_48 = arith.constant 1 : index
    %c0_49 = arith.constant 0 : index
    %c0_50 = arith.constant 0 : index
    %59 = vector.load %arg10[%c1_48, %c0_49, %c0_50] : memref<6x6x64xf32, #tpu.memory_space<vmem>>, vector<1x6x64xf32>
    %60 = vector.shape_cast %59 : vector<1x6x64xf32> to vector<6x64xf32>
    %61 = vector.extract_strided_slice %60 {offsets = [0, 0], sizes = [1, 64], strides = [1, 1]} : vector<6x64xf32> to vector<1x64xf32>
    %62 = vector.broadcast %41 : vector<2x1xf32> to vector<2x64xf32>
    %63 = vector.broadcast %61 : vector<1x64xf32> to vector<2x64xf32>
    %64 = arith.mulf %62, %63 : vector<2x64xf32>
    %65 = arith.addf %58, %64 : vector<2x64xf32>
    %cst_51 = arith.constant 0.000000e+00 : f32
    %66 = vector.broadcast %cst_51 : f32 to vector<2x64xf32>
    %67 = arith.maximumf %65, %66 : vector<2x64xf32>
    %c1_52 = arith.constant 1 : index
    %c0_53 = arith.constant 0 : index
    %68 = vector.load %arg12[%c1_52, %c0_53] : memref<6x64xf32, #tpu.memory_space<vmem>>, vector<1x64xf32>
    %69 = vector.broadcast %68 : vector<1x64xf32> to vector<2x64xf32>
    %70 = arith.mulf %67, %69 : vector<2x64xf32>
    %cst_54 = arith.constant dense<0.000000e+00> : vector<2xf32>
    %71 = vector.multi_reduction <add>, %70, %cst_54 [1] : vector<2x64xf32> to vector<2xf32>
    %72 = vector.shape_cast %71 : vector<2xf32> to vector<2x1xf32>
    %c0_55 = arith.constant 0 : index
    %c1_56 = arith.constant 1 : index
    %73 = vector.load %arg13[%c0_55, %c1_56] : memref<1x6xf32, #tpu.memory_space<vmem>>, vector<1x1xf32>
    %74 = vector.broadcast %73 : vector<1x1xf32> to vector<2x1xf32>
    %75 = arith.addf %72, %74 : vector<2x1xf32>
    %76 = vector.extract_strided_slice %2 {offsets = [0, 6], sizes = [2, 2], strides = [1, 1]} : vector<2x12xf32> to vector<2x2xf32>
    %77 = vector.extract_strided_slice %13 {offsets = [0, 6], sizes = [2, 2], strides = [1, 1]} : vector<2x12xf32> to vector<2x2xf32>
    %78 = vector.extract_strided_slice %14 {offsets = [0, 12], sizes = [2, 4], strides = [1, 1]} : vector<2x24xf32> to vector<2x4xf32>
    %c3 = arith.constant 3 : index
    %c0_57 = arith.constant 0 : index
    %c0_58 = arith.constant 0 : index
    %79 = vector.load %arg7[%c3, %c0_57, %c0_58] : memref<6x2x64xf32, #tpu.memory_space<vmem>>, vector<1x2x64xf32>
    %80 = vector.shape_cast %79 : vector<1x2x64xf32> to vector<2x64xf32>
    %cst_59 = arith.constant dense<0.000000e+00> : vector<2x64xf32>
    %81 = tpu.matmul %76, %80, %cst_59 {dimension_numbers = #tpu.dot_dimension_numbers<[1], [0], [0], [1], [0, 0, 1, 1], [], []>} : vector<2x2xf32>, vector<2x64xf32>, vector<2x64xf32> -> vector<2x64xf32>
    %c3_60 = arith.constant 3 : index
    %c0_61 = arith.constant 0 : index
    %c0_62 = arith.constant 0 : index
    %82 = vector.load %arg8[%c3_60, %c0_61, %c0_62] : memref<6x2x64xf32, #tpu.memory_space<vmem>>, vector<1x2x64xf32>
    %83 = vector.shape_cast %82 : vector<1x2x64xf32> to vector<2x64xf32>
    %cst_63 = arith.constant dense<0.000000e+00> : vector<2x64xf32>
    %84 = tpu.matmul %77, %83, %cst_63 {dimension_numbers = #tpu.dot_dimension_numbers<[1], [0], [0], [1], [0, 0, 1, 1], [], []>} : vector<2x2xf32>, vector<2x64xf32>, vector<2x64xf32> -> vector<2x64xf32>
    %85 = arith.addf %81, %84 : vector<2x64xf32>
    %c3_64 = arith.constant 3 : index
    %c0_65 = arith.constant 0 : index
    %c0_66 = arith.constant 0 : index
    %86 = vector.load %arg9[%c3_64, %c0_65, %c0_66] : memref<6x4x64xf32, #tpu.memory_space<vmem>>, vector<1x4x64xf32>
    %87 = vector.shape_cast %86 : vector<1x4x64xf32> to vector<4x64xf32>
    %cst_67 = arith.constant dense<0.000000e+00> : vector<2x64xf32>
    %88 = tpu.matmul %78, %87, %cst_67 {dimension_numbers = #tpu.dot_dimension_numbers<[1], [0], [0], [1], [0, 0, 1, 1], [], []>} : vector<2x4xf32>, vector<4x64xf32>, vector<2x64xf32> -> vector<2x64xf32>
    %89 = arith.addf %85, %88 : vector<2x64xf32>
    %c3_68 = arith.constant 3 : index
    %c0_69 = arith.constant 0 : index
    %90 = vector.load %arg11[%c3_68, %c0_69] : memref<6x64xf32, #tpu.memory_space<vmem>>, vector<1x64xf32>
    %91 = vector.broadcast %90 : vector<1x64xf32> to vector<2x64xf32>
    %92 = arith.addf %89, %91 : vector<2x64xf32>
    %c3_70 = arith.constant 3 : index
    %c0_71 = arith.constant 0 : index
    %c0_72 = arith.constant 0 : index
    %93 = vector.load %arg10[%c3_70, %c0_71, %c0_72] : memref<6x6x64xf32, #tpu.memory_space<vmem>>, vector<1x6x64xf32>
    %94 = vector.shape_cast %93 : vector<1x6x64xf32> to vector<6x64xf32>
    %95 = vector.extract_strided_slice %94 {offsets = [1, 0], sizes = [1, 64], strides = [1, 1]} : vector<6x64xf32> to vector<1x64xf32>
    %96 = vector.broadcast %75 : vector<2x1xf32> to vector<2x64xf32>
    %97 = vector.broadcast %95 : vector<1x64xf32> to vector<2x64xf32>
    %98 = arith.mulf %96, %97 : vector<2x64xf32>
    %99 = arith.addf %92, %98 : vector<2x64xf32>
    %cst_73 = arith.constant 0.000000e+00 : f32
    %100 = vector.broadcast %cst_73 : f32 to vector<2x64xf32>
    %101 = arith.maximumf %99, %100 : vector<2x64xf32>
    %c3_74 = arith.constant 3 : index
    %c0_75 = arith.constant 0 : index
    %102 = vector.load %arg12[%c3_74, %c0_75] : memref<6x64xf32, #tpu.memory_space<vmem>>, vector<1x64xf32>
    %103 = vector.broadcast %102 : vector<1x64xf32> to vector<2x64xf32>
    %104 = arith.mulf %101, %103 : vector<2x64xf32>
    %cst_76 = arith.constant dense<0.000000e+00> : vector<2xf32>
    %105 = vector.multi_reduction <add>, %104, %cst_76 [1] : vector<2x64xf32> to vector<2xf32>
    %106 = vector.shape_cast %105 : vector<2xf32> to vector<2x1xf32>
    %c0_77 = arith.constant 0 : index
    %c3_78 = arith.constant 3 : index
    %107 = vector.load %arg13[%c0_77, %c3_78] : memref<1x6xf32, #tpu.memory_space<vmem>>, vector<1x1xf32>
    %108 = vector.broadcast %107 : vector<1x1xf32> to vector<2x1xf32>
    %109 = arith.addf %106, %108 : vector<2x1xf32>
    %110 = vector.extract_strided_slice %2 {offsets = [0, 4], sizes = [2, 2], strides = [1, 1]} : vector<2x12xf32> to vector<2x2xf32>
    %111 = vector.extract_strided_slice %13 {offsets = [0, 4], sizes = [2, 2], strides = [1, 1]} : vector<2x12xf32> to vector<2x2xf32>
    %112 = vector.extract_strided_slice %14 {offsets = [0, 8], sizes = [2, 4], strides = [1, 1]} : vector<2x24xf32> to vector<2x4xf32>
    %c2 = arith.constant 2 : index
    %c0_79 = arith.constant 0 : index
    %c0_80 = arith.constant 0 : index
    %113 = vector.load %arg7[%c2, %c0_79, %c0_80] : memref<6x2x64xf32, #tpu.memory_space<vmem>>, vector<1x2x64xf32>
    %114 = vector.shape_cast %113 : vector<1x2x64xf32> to vector<2x64xf32>
    %cst_81 = arith.constant dense<0.000000e+00> : vector<2x64xf32>
    %115 = tpu.matmul %110, %114, %cst_81 {dimension_numbers = #tpu.dot_dimension_numbers<[1], [0], [0], [1], [0, 0, 1, 1], [], []>} : vector<2x2xf32>, vector<2x64xf32>, vector<2x64xf32> -> vector<2x64xf32>
    %c2_82 = arith.constant 2 : index
    %c0_83 = arith.constant 0 : index
    %c0_84 = arith.constant 0 : index
    %116 = vector.load %arg8[%c2_82, %c0_83, %c0_84] : memref<6x2x64xf32, #tpu.memory_space<vmem>>, vector<1x2x64xf32>
    %117 = vector.shape_cast %116 : vector<1x2x64xf32> to vector<2x64xf32>
    %cst_85 = arith.constant dense<0.000000e+00> : vector<2x64xf32>
    %118 = tpu.matmul %111, %117, %cst_85 {dimension_numbers = #tpu.dot_dimension_numbers<[1], [0], [0], [1], [0, 0, 1, 1], [], []>} : vector<2x2xf32>, vector<2x64xf32>, vector<2x64xf32> -> vector<2x64xf32>
    %119 = arith.addf %115, %118 : vector<2x64xf32>
    %c2_86 = arith.constant 2 : index
    %c0_87 = arith.constant 0 : index
    %c0_88 = arith.constant 0 : index
    %120 = vector.load %arg9[%c2_86, %c0_87, %c0_88] : memref<6x4x64xf32, #tpu.memory_space<vmem>>, vector<1x4x64xf32>
    %121 = vector.shape_cast %120 : vector<1x4x64xf32> to vector<4x64xf32>
    %cst_89 = arith.constant dense<0.000000e+00> : vector<2x64xf32>
    %122 = tpu.matmul %112, %121, %cst_89 {dimension_numbers = #tpu.dot_dimension_numbers<[1], [0], [0], [1], [0, 0, 1, 1], [], []>} : vector<2x4xf32>, vector<4x64xf32>, vector<2x64xf32> -> vector<2x64xf32>
    %123 = arith.addf %119, %122 : vector<2x64xf32>
    %c2_90 = arith.constant 2 : index
    %c0_91 = arith.constant 0 : index
    %124 = vector.load %arg11[%c2_90, %c0_91] : memref<6x64xf32, #tpu.memory_space<vmem>>, vector<1x64xf32>
    %125 = vector.broadcast %124 : vector<1x64xf32> to vector<2x64xf32>
    %126 = arith.addf %123, %125 : vector<2x64xf32>
    %c2_92 = arith.constant 2 : index
    %c0_93 = arith.constant 0 : index
    %c0_94 = arith.constant 0 : index
    %127 = vector.load %arg10[%c2_92, %c0_93, %c0_94] : memref<6x6x64xf32, #tpu.memory_space<vmem>>, vector<1x6x64xf32>
    %128 = vector.shape_cast %127 : vector<1x6x64xf32> to vector<6x64xf32>
    %129 = vector.extract_strided_slice %128 {offsets = [0, 0], sizes = [1, 64], strides = [1, 1]} : vector<6x64xf32> to vector<1x64xf32>
    %130 = vector.broadcast %41 : vector<2x1xf32> to vector<2x64xf32>
    %131 = vector.broadcast %129 : vector<1x64xf32> to vector<2x64xf32>
    %132 = arith.mulf %130, %131 : vector<2x64xf32>
    %133 = arith.addf %126, %132 : vector<2x64xf32>
    %134 = vector.extract_strided_slice %128 {offsets = [1, 0], sizes = [1, 64], strides = [1, 1]} : vector<6x64xf32> to vector<1x64xf32>
    %135 = vector.broadcast %75 : vector<2x1xf32> to vector<2x64xf32>
    %136 = vector.broadcast %134 : vector<1x64xf32> to vector<2x64xf32>
    %137 = arith.mulf %135, %136 : vector<2x64xf32>
    %138 = arith.addf %133, %137 : vector<2x64xf32>
    %cst_95 = arith.constant 0.000000e+00 : f32
    %139 = vector.broadcast %cst_95 : f32 to vector<2x64xf32>
    %140 = arith.maximumf %138, %139 : vector<2x64xf32>
    %c2_96 = arith.constant 2 : index
    %c0_97 = arith.constant 0 : index
    %141 = vector.load %arg12[%c2_96, %c0_97] : memref<6x64xf32, #tpu.memory_space<vmem>>, vector<1x64xf32>
    %142 = vector.broadcast %141 : vector<1x64xf32> to vector<2x64xf32>
    %143 = arith.mulf %140, %142 : vector<2x64xf32>
    %cst_98 = arith.constant dense<0.000000e+00> : vector<2xf32>
    %144 = vector.multi_reduction <add>, %143, %cst_98 [1] : vector<2x64xf32> to vector<2xf32>
    %145 = vector.shape_cast %144 : vector<2xf32> to vector<2x1xf32>
    %c0_99 = arith.constant 0 : index
    %c2_100 = arith.constant 2 : index
    %146 = vector.load %arg13[%c0_99, %c2_100] : memref<1x6xf32, #tpu.memory_space<vmem>>, vector<1x1xf32>
    %147 = vector.broadcast %146 : vector<1x1xf32> to vector<2x1xf32>
    %148 = arith.addf %145, %147 : vector<2x1xf32>
    %149 = vector.extract_strided_slice %2 {offsets = [0, 8], sizes = [2, 2], strides = [1, 1]} : vector<2x12xf32> to vector<2x2xf32>
    %150 = vector.extract_strided_slice %13 {offsets = [0, 8], sizes = [2, 2], strides = [1, 1]} : vector<2x12xf32> to vector<2x2xf32>
    %151 = vector.extract_strided_slice %14 {offsets = [0, 16], sizes = [2, 4], strides = [1, 1]} : vector<2x24xf32> to vector<2x4xf32>
    %c4 = arith.constant 4 : index
    %c0_101 = arith.constant 0 : index
    %c0_102 = arith.constant 0 : index
    %152 = vector.load %arg7[%c4, %c0_101, %c0_102] : memref<6x2x64xf32, #tpu.memory_space<vmem>>, vector<1x2x64xf32>
    %153 = vector.shape_cast %152 : vector<1x2x64xf32> to vector<2x64xf32>
    %cst_103 = arith.constant dense<0.000000e+00> : vector<2x64xf32>
    %154 = tpu.matmul %149, %153, %cst_103 {dimension_numbers = #tpu.dot_dimension_numbers<[1], [0], [0], [1], [0, 0, 1, 1], [], []>} : vector<2x2xf32>, vector<2x64xf32>, vector<2x64xf32> -> vector<2x64xf32>
    %c4_104 = arith.constant 4 : index
    %c0_105 = arith.constant 0 : index
    %c0_106 = arith.constant 0 : index
    %155 = vector.load %arg8[%c4_104, %c0_105, %c0_106] : memref<6x2x64xf32, #tpu.memory_space<vmem>>, vector<1x2x64xf32>
    %156 = vector.shape_cast %155 : vector<1x2x64xf32> to vector<2x64xf32>
    %cst_107 = arith.constant dense<0.000000e+00> : vector<2x64xf32>
    %157 = tpu.matmul %150, %156, %cst_107 {dimension_numbers = #tpu.dot_dimension_numbers<[1], [0], [0], [1], [0, 0, 1, 1], [], []>} : vector<2x2xf32>, vector<2x64xf32>, vector<2x64xf32> -> vector<2x64xf32>
    %158 = arith.addf %154, %157 : vector<2x64xf32>
    %c4_108 = arith.constant 4 : index
    %c0_109 = arith.constant 0 : index
    %c0_110 = arith.constant 0 : index
    %159 = vector.load %arg9[%c4_108, %c0_109, %c0_110] : memref<6x4x64xf32, #tpu.memory_space<vmem>>, vector<1x4x64xf32>
    %160 = vector.shape_cast %159 : vector<1x4x64xf32> to vector<4x64xf32>
    %cst_111 = arith.constant dense<0.000000e+00> : vector<2x64xf32>
    %161 = tpu.matmul %151, %160, %cst_111 {dimension_numbers = #tpu.dot_dimension_numbers<[1], [0], [0], [1], [0, 0, 1, 1], [], []>} : vector<2x4xf32>, vector<4x64xf32>, vector<2x64xf32> -> vector<2x64xf32>
    %162 = arith.addf %158, %161 : vector<2x64xf32>
    %c4_112 = arith.constant 4 : index
    %c0_113 = arith.constant 0 : index
    %163 = vector.load %arg11[%c4_112, %c0_113] : memref<6x64xf32, #tpu.memory_space<vmem>>, vector<1x64xf32>
    %164 = vector.broadcast %163 : vector<1x64xf32> to vector<2x64xf32>
    %165 = arith.addf %162, %164 : vector<2x64xf32>
    %c4_114 = arith.constant 4 : index
    %c0_115 = arith.constant 0 : index
    %c0_116 = arith.constant 0 : index
    %166 = vector.load %arg10[%c4_114, %c0_115, %c0_116] : memref<6x6x64xf32, #tpu.memory_space<vmem>>, vector<1x6x64xf32>
    %167 = vector.shape_cast %166 : vector<1x6x64xf32> to vector<6x64xf32>
    %168 = vector.extract_strided_slice %167 {offsets = [2, 0], sizes = [1, 64], strides = [1, 1]} : vector<6x64xf32> to vector<1x64xf32>
    %169 = vector.broadcast %148 : vector<2x1xf32> to vector<2x64xf32>
    %170 = vector.broadcast %168 : vector<1x64xf32> to vector<2x64xf32>
    %171 = arith.mulf %169, %170 : vector<2x64xf32>
    %172 = arith.addf %165, %171 : vector<2x64xf32>
    %173 = vector.extract_strided_slice %167 {offsets = [3, 0], sizes = [1, 64], strides = [1, 1]} : vector<6x64xf32> to vector<1x64xf32>
    %174 = vector.broadcast %109 : vector<2x1xf32> to vector<2x64xf32>
    %175 = vector.broadcast %173 : vector<1x64xf32> to vector<2x64xf32>
    %176 = arith.mulf %174, %175 : vector<2x64xf32>
    %177 = arith.addf %172, %176 : vector<2x64xf32>
    %cst_117 = arith.constant 0.000000e+00 : f32
    %178 = vector.broadcast %cst_117 : f32 to vector<2x64xf32>
    %179 = arith.maximumf %177, %178 : vector<2x64xf32>
    %c4_118 = arith.constant 4 : index
    %c0_119 = arith.constant 0 : index
    %180 = vector.load %arg12[%c4_118, %c0_119] : memref<6x64xf32, #tpu.memory_space<vmem>>, vector<1x64xf32>
    %181 = vector.broadcast %180 : vector<1x64xf32> to vector<2x64xf32>
    %182 = arith.mulf %179, %181 : vector<2x64xf32>
    %cst_120 = arith.constant dense<0.000000e+00> : vector<2xf32>
    %183 = vector.multi_reduction <add>, %182, %cst_120 [1] : vector<2x64xf32> to vector<2xf32>
    %184 = vector.shape_cast %183 : vector<2xf32> to vector<2x1xf32>
    %c0_121 = arith.constant 0 : index
    %c4_122 = arith.constant 4 : index
    %185 = vector.load %arg13[%c0_121, %c4_122] : memref<1x6xf32, #tpu.memory_space<vmem>>, vector<1x1xf32>
    %186 = vector.broadcast %185 : vector<1x1xf32> to vector<2x1xf32>
    %187 = arith.addf %184, %186 : vector<2x1xf32>
    %188 = vector.extract_strided_slice %2 {offsets = [0, 10], sizes = [2, 2], strides = [1, 1]} : vector<2x12xf32> to vector<2x2xf32>
    %189 = vector.extract_strided_slice %13 {offsets = [0, 10], sizes = [2, 2], strides = [1, 1]} : vector<2x12xf32> to vector<2x2xf32>
    %190 = vector.extract_strided_slice %14 {offsets = [0, 20], sizes = [2, 4], strides = [1, 1]} : vector<2x24xf32> to vector<2x4xf32>
    %c5 = arith.constant 5 : index
    %c0_123 = arith.constant 0 : index
    %c0_124 = arith.constant 0 : index
    %191 = vector.load %arg7[%c5, %c0_123, %c0_124] : memref<6x2x64xf32, #tpu.memory_space<vmem>>, vector<1x2x64xf32>
    %192 = vector.shape_cast %191 : vector<1x2x64xf32> to vector<2x64xf32>
    %cst_125 = arith.constant dense<0.000000e+00> : vector<2x64xf32>
    %193 = tpu.matmul %188, %192, %cst_125 {dimension_numbers = #tpu.dot_dimension_numbers<[1], [0], [0], [1], [0, 0, 1, 1], [], []>} : vector<2x2xf32>, vector<2x64xf32>, vector<2x64xf32> -> vector<2x64xf32>
    %c5_126 = arith.constant 5 : index
    %c0_127 = arith.constant 0 : index
    %c0_128 = arith.constant 0 : index
    %194 = vector.load %arg8[%c5_126, %c0_127, %c0_128] : memref<6x2x64xf32, #tpu.memory_space<vmem>>, vector<1x2x64xf32>
    %195 = vector.shape_cast %194 : vector<1x2x64xf32> to vector<2x64xf32>
    %cst_129 = arith.constant dense<0.000000e+00> : vector<2x64xf32>
    %196 = tpu.matmul %189, %195, %cst_129 {dimension_numbers = #tpu.dot_dimension_numbers<[1], [0], [0], [1], [0, 0, 1, 1], [], []>} : vector<2x2xf32>, vector<2x64xf32>, vector<2x64xf32> -> vector<2x64xf32>
    %197 = arith.addf %193, %196 : vector<2x64xf32>
    %c5_130 = arith.constant 5 : index
    %c0_131 = arith.constant 0 : index
    %c0_132 = arith.constant 0 : index
    %198 = vector.load %arg9[%c5_130, %c0_131, %c0_132] : memref<6x4x64xf32, #tpu.memory_space<vmem>>, vector<1x4x64xf32>
    %199 = vector.shape_cast %198 : vector<1x4x64xf32> to vector<4x64xf32>
    %cst_133 = arith.constant dense<0.000000e+00> : vector<2x64xf32>
    %200 = tpu.matmul %190, %199, %cst_133 {dimension_numbers = #tpu.dot_dimension_numbers<[1], [0], [0], [1], [0, 0, 1, 1], [], []>} : vector<2x4xf32>, vector<4x64xf32>, vector<2x64xf32> -> vector<2x64xf32>
    %201 = arith.addf %197, %200 : vector<2x64xf32>
    %c5_134 = arith.constant 5 : index
    %c0_135 = arith.constant 0 : index
    %202 = vector.load %arg11[%c5_134, %c0_135] : memref<6x64xf32, #tpu.memory_space<vmem>>, vector<1x64xf32>
    %203 = vector.broadcast %202 : vector<1x64xf32> to vector<2x64xf32>
    %204 = arith.addf %201, %203 : vector<2x64xf32>
    %c5_136 = arith.constant 5 : index
    %c0_137 = arith.constant 0 : index
    %c0_138 = arith.constant 0 : index
    %205 = vector.load %arg10[%c5_136, %c0_137, %c0_138] : memref<6x6x64xf32, #tpu.memory_space<vmem>>, vector<1x6x64xf32>
    %206 = vector.shape_cast %205 : vector<1x6x64xf32> to vector<6x64xf32>
    %207 = vector.extract_strided_slice %206 {offsets = [0, 0], sizes = [1, 64], strides = [1, 1]} : vector<6x64xf32> to vector<1x64xf32>
    %208 = vector.broadcast %41 : vector<2x1xf32> to vector<2x64xf32>
    %209 = vector.broadcast %207 : vector<1x64xf32> to vector<2x64xf32>
    %210 = arith.mulf %208, %209 : vector<2x64xf32>
    %211 = arith.addf %204, %210 : vector<2x64xf32>
    %212 = vector.extract_strided_slice %206 {offsets = [4, 0], sizes = [1, 64], strides = [1, 1]} : vector<6x64xf32> to vector<1x64xf32>
    %213 = vector.broadcast %187 : vector<2x1xf32> to vector<2x64xf32>
    %214 = vector.broadcast %212 : vector<1x64xf32> to vector<2x64xf32>
    %215 = arith.mulf %213, %214 : vector<2x64xf32>
    %216 = arith.addf %211, %215 : vector<2x64xf32>
    %cst_139 = arith.constant 0.000000e+00 : f32
    %217 = vector.broadcast %cst_139 : f32 to vector<2x64xf32>
    %218 = arith.maximumf %216, %217 : vector<2x64xf32>
    %c5_140 = arith.constant 5 : index
    %c0_141 = arith.constant 0 : index
    %219 = vector.load %arg12[%c5_140, %c0_141] : memref<6x64xf32, #tpu.memory_space<vmem>>, vector<1x64xf32>
    %220 = vector.broadcast %219 : vector<1x64xf32> to vector<2x64xf32>
    %221 = arith.mulf %218, %220 : vector<2x64xf32>
    %cst_142 = arith.constant dense<0.000000e+00> : vector<2xf32>
    %222 = vector.multi_reduction <add>, %221, %cst_142 [1] : vector<2x64xf32> to vector<2xf32>
    %223 = vector.shape_cast %222 : vector<2xf32> to vector<2x1xf32>
    %c0_143 = arith.constant 0 : index
    %c5_144 = arith.constant 5 : index
    %224 = vector.load %arg13[%c0_143, %c5_144] : memref<1x6xf32, #tpu.memory_space<vmem>>, vector<1x1xf32>
    %225 = vector.broadcast %224 : vector<1x1xf32> to vector<2x1xf32>
    %226 = arith.addf %223, %225 : vector<2x1xf32>
    %227 = tpu.concatenate %41, %75, %148, %109, %187, %226 in 1 : vector<2x1xf32>, vector<2x1xf32>, vector<2x1xf32>, vector<2x1xf32>, vector<2x1xf32>, vector<2x1xf32> -> vector<2x6xf32>
    %c0_145 = arith.constant 0 : index
    %c0_146 = arith.constant 0 : index
    %228 = vector.load %arg14[%c0_145, %c0_146] : memref<2x6xf32, #tpu.memory_space<vmem>>, vector<2x6xf32>
    tpu.vector_store %arg14[%c0_145, %c0_146], %227 {strides = array<i32>} : memref<2x6xf32, #tpu.memory_space<vmem>>, vector<2x6xf32>,
    return
  }
}

</mosaic_0001>

<bundles_post_ra>
// kernel: forward.1
= control target key start
LH: loop header
LB: loop body
LE: loop exit
PB: predicated region body
PF: predicated region fallthrough
CT: control target
= control target key end

     0   :  { %19 = vsyncpa [#allocation3], 0  ;;  %s2766_s0 = inlined_call_operand.vmem [shape: f32[2,4], index: 0, kind: input, shape index: {}]   ;;  %s2767_s1 = inlined_call_operand.vmem [shape: f32[2,3], index: 1, kind: input, shape index: {}]   ;;  %s2768_s2 = inlined_call_operand.vmem [shape: f32[2,24], index: 2, kind: input, shape index: {}]   ;;  %s2769_s3 = inlined_call_operand.vmem [shape: f32[3,12], index: 3, kind: input, shape index: {}]   ;;  %s2770_s4 = inlined_call_operand.hbm [shape: f32[4,12], index: 4, kind: input, shape index: {}]   ;;  %s2771_s5 = inlined_call_operand.hbm [shape: f32[3,12], index: 5, kind: input, shape index: {}]   ;;  %s2772_s6 = inlined_call_operand.hbm [shape: f32[3,12], index: 6, kind: input, shape index: {}]   ;;  %s2773_s7 = inlined_call_operand.hbm [shape: f32[6,2,64], index: 7, kind: input, shape index: {}]   ;;  %s2774_s8 = inlined_call_operand.hbm [shape: f32[6,2,64], index: 8, kind: input, shape index: {}]   ;;  %s2775_s9 = inlined_call_operand.hbm [shape: f32[6,4,64], index: 9, kind: input, shape index: {}]   ;;  %s2776_s10 = inlined_call_operand.hbm [shape: f32[6,6,64], index: 10, kind: input, shape index: {}]   ;;  %s2777_s11 = inlined_call_operand.hbm [shape: f32[6,64], index: 11, kind: input, shape index: {}]   ;;  %s2778_s12 = inlined_call_operand.vmem [shape: f32[6,64], index: 12, kind: input, shape index: {}]   ;;  %s2779_s13 = inlined_call_operand.hbm [shape: f32[1,6], index: 13, kind: input, shape index: {}]   ;;  %s2780_s14 = inlined_call_operand.hbm [shape: f32[2,6], index: 14, kind: output, shape index: {}]  }
   0x1   :  { %20 = vsyncpa [#allocation6], 0 }
   0x2   :  { %21 = vsyncpa [#allocation9], 0 }
   0x3   :  { %22 = vsyncpa [#allocation12], 0 }
   0x4   :  { %23 = vsyncpa [#allocation15], 0 }
   0x5   :  { %24 = vsyncpa [#allocation4], 0  ;;  %s2421_s29 = smov [#allocation5]   ;;  %s2422_s15 = smov [#allocation8]  }
   0x6   :  { %s49_s30 = sshll.u32 %s2421_s29, 4  ;;  %s68_s16 = sshll.u32 %s2422_s15, 4  ;;  %s50_s30 = int_to_ptr.vmem [resolvable:$true] %s49_s30  ;;  %s69_s16 = int_to_ptr.vmem [resolvable:$true] %s68_s16 }
   0x7   :  { %s2217_s17 = scalar_lea.vmem %s50_s30, 64  ;;  %p2222_p1 = scmp.lt.s32.totalorder %s50_s30, %s50_s30 }
   0x8   :  { %p2218_p0 = scmp.ne.s32.totalorder %s50_s30, %s2217_s17  ;;  %p2223_p2 = scmp.lt.s32.totalorder %s2217_s17, %s2217_s17 }
   0xa   :  { %p2224_p3 = por %p2223_p2, %p2222_p1 }
   0xc   :  { %p2225_p4 = pnand %p2224_p3, %p2218_p0 }
   0xe   :  { %2228 = shalt.err (!%p2225_p4)
}
   0xf   :  { %52 = dma.hbm_to_vmem [thread:$0]  %s2771_s5, 64, %s50_s30, [#allocation6]  }
  0x10   :  { %s2237_s20 = scalar_lea.vmem %s69_s16, 192  ;;  %p2242_p6 = scmp.lt.s32.totalorder %s69_s16, %s69_s16 }
  0x11   :  { %p2238_p5 = scmp.ne.s32.totalorder %s69_s16, %s2237_s20  ;;  %p2243_p7 = scmp.lt.s32.totalorder %s2237_s20, %s2237_s20 }
  0x13   :  { %p2244_p8 = por %p2243_p7, %p2242_p6 }
  0x15   :  { %p2245_p9 = pnand %p2244_p8, %p2238_p5 }
  0x17   :  { %2248 = shalt.err (!%p2245_p9)
}
  0x18   :  { %s2423_s21 = smov 32   ;;  %s2424_s22 = smov 2  }
  0x19   :  { %74 = dma.hbm_to_vmem [thread:$0]  %s2773_s7, 192, %s69_s16, [#allocation9], %s2423_s21, %s2423_s21, %s2424_s22  }
  0x1a   :  { %s2425_s25 = smov [#allocation11]  }
  0x1b   :  { %s92_s26 = sshll.u32 %s2425_s25, 4  ;;  %s93_s26 = int_to_ptr.vmem [resolvable:$true] %s92_s26 }
  0x1c   :  { %s2257_s5 = scalar_lea.vmem %s93_s26, 384  ;;  %p2262_p11 = scmp.lt.s32.totalorder %s93_s26, %s93_s26 }
  0x1d   :  { %p2258_p10 = scmp.ne.s32.totalorder %s93_s26, %s2257_s5  ;;  %p2263_p12 = scmp.lt.s32.totalorder %s2257_s5, %s2257_s5 }
  0x1f   :  { %p2264_p13 = por %p2263_p12, %p2262_p11 }
  0x21   :  { %p2265_p0 = pnand %p2264_p13, %p2258_p10 }
  0x23   :  { %2268 = shalt.err (!%p2265_p0)
}
  0x24   :  { %s2426_s27 = smov 64   ;;  %s2427_s28 = smov 4  }
  0x25   :  { %98 = dma.hbm_to_vmem [thread:$0]  %s2775_s9, 384, %s93_s26, [#allocation12], %s2426_s27, %s2426_s27, %s2427_s28  }
  0x26   :  { %s2428_s15 = smov [#allocation14]   ;;  %s2429_s7 = smov [#allocation2]  }
  0x27   :  { %s117_s17 = sshll.u32 %s2428_s15, 4  ;;  %s39_s16 = sshll.u32 %s2429_s7, 4  ;;  %s118_s17 = int_to_ptr.vmem [resolvable:$true] %s117_s17  ;;  %s40_s16 = int_to_ptr.vmem [resolvable:$true] %s39_s16 }
  0x28   :  { %s2277_s18 = scalar_lea.vmem %s118_s17, 128  ;;  %p2282_p2 = scmp.lt.s32.totalorder %s118_s17, %s118_s17 }
  0x29   :  { %p2278_p1 = scmp.ne.s32.totalorder %s118_s17, %s2277_s18  ;;  %p2283_p3 = scmp.lt.s32.totalorder %s2277_s18, %s2277_s18 }
  0x2b   :  { %p2284_p4 = por %p2283_p3, %p2282_p2 }
  0x2d   :  { %p2285_p5 = pnand %p2284_p4, %p2278_p1 }
  0x2f   :  { %2288 = shalt.err (!%p2285_p5)
}
  0x30   :  { %120 = dma.hbm_to_vmem [thread:$0]  %s2777_s11, 128, %s118_s17, [#allocation15]  }
  0x31   :  { %s2297_s23 = scalar_lea.vmem %s40_s16, 64  ;;  %p2302_p7 = scmp.lt.s32.totalorder %s40_s16, %s40_s16 }
  0x32   :  { %p2298_p6 = scmp.ne.s32.totalorder %s40_s16, %s2297_s23  ;;  %p2303_p8 = scmp.lt.s32.totalorder %s2297_s23, %s2297_s23 }
  0x34   :  { %p2304_p9 = por %p2303_p8, %p2302_p7 }
  0x36   :  { %p2305_p10 = pnand %p2304_p9, %p2298_p6 }
  0x38   :  { %2308 = shalt.err (!%p2305_p10)
}
  0x39   :  { %42 = dma.hbm_to_vmem [thread:$0]  %s2770_s4, 64, %s40_s16, [#allocation3]  }
  0x3a   :  { %s2430_s25 = smov [#allocation7]   ;;  %s2431_s5 = smov [#allocation10]  }
  0x3b   :  { %s59_s26 = sshll.u32 %s2430_s25, 4  ;;  %s80_s27 = sshll.u32 %s2431_s5, 4  ;;  %s60_s26 = int_to_ptr.vmem [resolvable:$true] %s59_s26  ;;  %s81_s27 = int_to_ptr.vmem [resolvable:$true] %s80_s27 }
  0x3c   :  { %s2317_s28 = scalar_lea.vmem %s60_s26, 64  ;;  %p2322_p12 = scmp.lt.s32.totalorder %s60_s26, %s60_s26 }
  0x3d   :  { %p2318_p11 = scmp.ne.s32.totalorder %s60_s26, %s2317_s28  ;;  %p2323_p13 = scmp.lt.s32.totalorder %s2317_s28, %s2317_s28 }
  0x3f   :  { %p2324_p0 = por %p2323_p13, %p2322_p12 }
  0x41   :  { %p2325_p1 = pnand %p2324_p0, %p2318_p11 }
  0x43   :  { %2328 = shalt.err (!%p2325_p1)
}
  0x44   :  { %62 = dma.hbm_to_vmem [thread:$0]  %s2772_s6, 64, %s60_s26, [#allocation6]  }
  0x45   :  { %s2337_s30 = scalar_lea.vmem %s81_s27, 192  ;;  %p2342_p3 = scmp.lt.s32.totalorder %s81_s27, %s81_s27 }
  0x46   :  { %p2338_p2 = scmp.ne.s32.totalorder %s81_s27, %s2337_s30  ;;  %p2343_p4 = scmp.lt.s32.totalorder %s2337_s30, %s2337_s30 }
  0x48   :  { %p2344_p5 = por %p2343_p4, %p2342_p3 }
  0x4a   :  { %p2345_p6 = pnand %p2344_p5, %p2338_p2 }
  0x4c   :  { %2348 = shalt.err (!%p2345_p6)
}
  0x4d   :  { %86 = dma.hbm_to_vmem [thread:$0]  %s2774_s8, 192, %s81_s27, [#allocation9], %s2423_s21, %s2423_s21, %s2424_s22  }
  0x4e   :  { %s2432_s17 = smov [#allocation13]  }
  0x4f   :  { %s104_s7 = sshll.u32 %s2432_s17, 4  ;;  %s105_s7 = int_to_ptr.vmem [resolvable:$true] %s104_s7 }
  0x50   :  { %s2357_s16 = scalar_lea.vmem %s105_s7, 768  ;;  %p2362_p8 = scmp.lt.s32.totalorder %s105_s7, %s105_s7 }
  0x51   :  { %p2358_p7 = scmp.ne.s32.totalorder %s105_s7, %s2357_s16  ;;  %p2363_p9 = scmp.lt.s32.totalorder %s2357_s16, %s2357_s16 }
  0x53   :  { %p2364_p10 = por %p2363_p9, %p2362_p8 }
  0x55   :  { %p2365_p11 = pnand %p2364_p10, %p2358_p7 }
  0x57   :  { %2368 = shalt.err (!%p2365_p11)
}
  0x58   :  { %s2433_s6 = smov 128   ;;  %s2434_s18 = smov 8  }
  0x59   :  { %110 = dma.hbm_to_vmem [thread:$0]  %s2776_s10, 768, %s105_s7, [#allocation12], %s2433_s6, %s2433_s6, %s2434_s18  }
  0x5a   :  { %s2435_s23 = smov [#allocation16]  }
  0x5b   :  { %s129_s9 = sshll.u32 %s2435_s23, 4  ;;  %s130_s9 = int_to_ptr.vmem [resolvable:$true] %s129_s9 }
  0x5c   :  { %s2377_s8 = scalar_lea.vmem %s130_s9, 16  ;;  %s2381_s21 = scalar_lea.vmem %s130_s9, 32 }
  0x5d   :  { %p2378_p12 = scmp.ne.s32.totalorder %s130_s9, %s2377_s8  ;;  %p2382_p13 = scmp.lt.s32.totalorder %s130_s9, %s130_s9 }
  0x5e   :  { %p2383_p0 = scmp.lt.s32.totalorder %s2381_s21, %s2377_s8 }
  0x60   :  { %p2384_p1 = por %p2383_p0, %p2382_p13 }
  0x62   :  { %p2385_p2 = pnand %p2384_p1, %p2378_p12 }
  0x64   :  { %2388 = shalt.err (!%p2385_p2)
}
  0x65   :  { %132 = dma.hbm_to_vmem [thread:$0]  %s2779_s13, 16, %s130_s9, [#allocation15]  }
  0x66   :  { %2409 = dma.done.wait [#allocation3], 64  }
  0x67   :  { %2410 = vsyncadd [#allocation3], 4294967232 }
  0x68   :  { %2411 = dma.done.wait [#allocation6], 128  }
  0x69   :  { %2412 = vsyncadd [#allocation6], 4294967168 }
  0x6a   :  { %2413 = dma.done.wait [#allocation9], 384  }
  0x6b   :  { %2414 = vsyncadd [#allocation9], 4294966912 }
  0x6c   :  { %2415 = dma.done.wait [#allocation12], 1152  }
  0x6d   :  { %2416 = vsyncadd [#allocation12], 4294966144 }
  0x6e   :  { %2417 = dma.done.wait [#allocation15], 144  }
  0x6f   :  { %2418 = vsyncadd [#allocation15], 4294967152  ;;  %v2436_v0 = vmov 0.0   ;;  %vm2437_vm0 = vmmov 0   ;;  %vm166_vm1 = vcmask 1043456   ;;  %vm162_vm2 = vcmask 31744  }
  0x70   :  { %2068 = vmatprep.subr.mxu0 %v2436_v0  ;;  %2073 = vmatprep.subr.mxu1 %v2436_v0  ;;  %v161_v1 = vld [vmem:[#allocation2] sm:$0xf]  ;;  %v241_v2 = vld [vmem:[#allocation7] sm:$0x7]  ;;  %vm336_vm3 = vcmask 1041408   ;;  %vm255_vm4 = vcmask 1042432  }
  0x71   :  { %2070 = vmatprep.mubr.msk.f32.mxu0 %vm2437_vm0, %v2436_v0  ;;  %2075 = vmatprep.mubr.msk.f32.mxu1 %vm2437_vm0, %v2436_v0  ;;  %v242_v3 = vmul.f32 1.442695, %v241_v2  ;;  %v160_v4 = vld [vmem:[%s2766_s0] sm:$0x3]  ;;  %v331_v5 = vld [vmem:[#allocation10] sm:$0x3] }
  0x72   :  { %2069 = vmatpush3.msk.msra.mxu0 %vm166_vm1, %v161_v1  ;;  %v247_v9 = vld [vmem:[%s2769_s3] sm:$0x7]  ;;  %v240_v11 = vld [vmem:[#allocation5] sm:$0x7]  ;;  %vm251_vm5 = vcmask 23552   ;;  %vm332_vm6 = vcmask 15360  }
  0x73   :  { %2071 = vmatmul.mubr.msk.f32.vlgmr.msra.gmra.mxu0 %vm162_vm2, %v160_v4  ;;  %2078 = vmatprep.subr.mxu0 %v2436_v0  ;;  %2205 = vpow2.f32 %v242_v3  ;;  %v250_v14 = vld [vmem:[%s2767_s1] sm:$0x3]  ;;  %v330_v15 = vld [vmem:[#allocation8] sm:$0x3]  ;;  %s2438_s1 = smov 124   ;;  %s2440_s28 = smov 122  }
  0x74   :  { %2079 = vmatpush3.msk.msra.mxu0 %vm336_vm3, %v331_v5  ;;  %2080 = vmatprep.mubr.msk.f32.mxu0 %vm2437_vm0, %v2436_v0  ;;  %v2591_v16 = vld [vmem:[%s2768_s2] sm:$0x3]  ;;  %v592_v19 = vld [vmem:[#allocation10 + $0x2] sm:$0x3]  ;;  %v486_v20 = vld [vmem:[#allocation11] sm:$0xf] }
  0x75   :  { %2088 = vmatprep.subr.mxu0 %v2436_v0  ;;  %749 = vrot.lane.b32.xlu1 %v2591_v16, %s2438_s1  ;;  %s2439_s2 = smov 126   ;;  %v590_v23 = vld [vmem:[#allocation8 + $0x2] sm:$0x3]  ;;  %s2441_s11 = smov 116   ;;  %v748_v24 = vld [vmem:[#allocation11 + $0x4] sm:$0xf] }
  0x76   :  { %s2442_s29 = smov 120   ;;  %v860_v27 = vld [vmem:[#allocation10 + $0x6] sm:$0x3]  ;;  %v858_v29 = vld [vmem:[#allocation8 + $0x6] sm:$0x3]  ;;  %vm577_vm7 = vcmask 517120  }
  0x77   :  { %v1016_v30 = vld [vmem:[#allocation11 + $0xc] sm:$0xf]  ;;  %v1128_v32 = vld [vmem:[#allocation10 + $0x4] sm:$0x3]  ;;  %v1284_v36 = vld [vmem:[#allocation11 + $0x8] sm:$0xf] }
  0x78   :  { %v1126_v34 = vld [vmem:[#allocation8 + $0x4] sm:$0x3]  ;;  %v1985_v46 = vld [vmem:[#allocation14] ss:$0 sm:$0xff]  ;;  %v1986_v50 = vld [vmem:[%s2778_s12] ss:$0 sm:$0xff] }
  0x79   :  { %v2443_v54 = vmov 0   ;;  %v1397_v55 = vld [vmem:[#allocation10 + $0x8] sm:$0x3]  ;;  %v1395_v56 = vld [vmem:[#allocation8 + $0x8] sm:$0x3]  ;;  %s2444_s15 = smov 112  }
  0x7a   :  { %2199 = vset.pattern.permute.xlu0 %v2443_v54  ;;  %s2446_s16 = smov 118   ;;  %s2449_s23 = smov 108   ;;  %vm1947_vm8 = vcmask 7168   ;;  %vm1952_vm9 = vcmask 39936   ;;  %vm1954_vm10 = vcmask 41984  }
  0x7b   :  { %s2451_s24 = smov [#allocation17]  }
  0x7c   :  { %s1962_s10 = sshll.u32 %s2451_s24, 4  ;;  %s1963_s10 = int_to_ptr.vmem [resolvable:$true] %s1962_s10 }
  0x7d   :  { %s2389_s13 = scalar_lea.vmem %s1963_s10, 32  ;;  %p2394_p4 = scmp.lt.s32.totalorder %s1963_s10, %s1963_s10 }
  0x7e   :  { %p2390_p3 = scmp.ne.s32.totalorder %s1963_s10, %s2389_s13  ;;  %p2395_p5 = scmp.lt.s32.totalorder %s2389_s13, %s2389_s13 }
  0x80   :  { %v2206_v6 = vpop.eup %2205  ;;  %p2396_p6 = por %p2395_p5, %p2394_p4 }
  0x81   :  { %v244_v7 = vadd.f32 1.0, %v2206_v6 }
  0x82   :  { %p2397_p7 = pnand %p2396_p6, %p2390_p3 }
  0x83   :  { %2207 = vlog2.f32 %v244_v7 }
  0x90   :  { %v2208_v8 = vpop.eup %2207 }
  0x91   :  { %v246_v10 = vmul.f32 0.6931472, %v2208_v8 }
  0x93   :  { %v248_v12 = vmul.f32 %v247_v9, %v246_v10 }
  0x95   :  { %v249_v13 = vadd.f32 %v248_v12, %v240_v11 }
  0x97   :  { %2074 = vmatpush3.msk.msra.mxu1 %vm255_vm4, %v249_v13 }
  0x98   :  { %2076 = vmatmul.mubr.msk.f32.vlgmr.msra.gmra.mxu1 %vm251_vm5, %v250_v14  ;;  %2083 = vmatprep.subr.mxu1 %v2436_v0 }
  0x99   :  { %2084 = vmatpush3.msk.msra.mxu1 %vm336_vm3, %v330_v15  ;;  %2085 = vmatprep.mubr.msk.f32.mxu1 %vm2437_vm0, %v2436_v0 }
  0x9a   :  { %2093 = vmatprep.subr.mxu1 %v2436_v0 }
  0xe7   :  { %v750_v26 = vpop.permute.xlu1 %749 }
 0x133   :  { %v2595_v17 = vpop.f32.mrf.mxu0 }
 0x134   :  { %2086 = vmatmul.mubr.msk.f32.vlgmr.msra.gmra.mxu1 %vm332_vm6, %v2595_v17 }
 0x135   :  { %v2072_v18 = vpop.f32.mrf.mxu0  ;;  %2095 = vmatprep.mubr.msk.f32.mxu1 %vm2437_vm0, %v2436_v0  ;;  %2094 = vmatpush3.msk.msra.mxu1 %vm336_vm3, %v592_v19 }
 0x136   :  { %2103 = vmatprep.subr.mxu1 %v2436_v0 }
 0x158   :  { %v2603_v21 = vpop.f32.mrf.mxu1 }
 0x159   :  { %593 = vrot.lane.b32.xlu0 %v2603_v21, %s2439_s2  ;;  %2081 = vmatmul.mubr.msk.f32.vlgmr.msra.gmra.mxu0 %vm332_vm6, %v2603_v21 }
 0x15a   :  { %2089 = vmatpush3.msk.msra.mxu0 %vm166_vm1, %v486_v20  ;;  %v2077_v22 = vpop.f32.mrf.mxu1  ;;  %2090 = vmatprep.mubr.msk.f32.mxu0 %vm2437_vm0, %v2436_v0  ;;  %v2684_v20 = vld [vmem:[#allocation16] ss:$0 sm:$0xff] }
 0x15b   :  { %2098 = vmatprep.subr.mxu0 %v2436_v0 }
 0x15d   :  { %2091 = vmatmul.mubr.msk.f32.vlgmr.msra.gmra.mxu0 %vm162_vm2, %v2591_v16  ;;  %670 = vrot.lane.b32.xlu0 %v2595_v17, %s2439_s2 }
 0x15e   :  { %2099 = vmatpush3.msk.msra.mxu0 %vm336_vm3, %v590_v23  ;;  %2100 = vmatprep.mubr.msk.f32.mxu0 %vm2437_vm0, %v2436_v0 }
 0x15f   :  { %2108 = vmatprep.subr.mxu0 %v2436_v0 }
 0x161   :  { %861 = vrot.lane.b32.xlu0 %v2603_v21, %s2440_s28 }
 0x165   :  { %938 = vrot.lane.b32.xlu0 %v2595_v17, %s2440_s28 }
 0x169   :  { %1017 = vrot.lane.b32.xlu0 %v2591_v16, %s2441_s11 }
 0x16d   :  { %1129 = vrot.lane.b32.xlu0 %v2603_v21, %s2438_s1 }
 0x171   :  { %1206 = vrot.lane.b32.xlu0 %v2595_v17, %s2438_s1 }
 0x175   :  { %1285 = vrot.lane.b32.xlu0 %v2591_v16, %s2442_s29 }
 0x1cb   :  { %v594_v25 = vpop.permute.xlu0 %593 }
 0x1cc   :  { %2096 = vmatmul.mubr.msk.f32.vlgmr.msra.gmra.mxu1 %vm332_vm6, %v594_v25 }
 0x1cd   :  { %2104 = vmatpush3.msk.msra.mxu1 %vm166_vm1, %v748_v24  ;;  %2105 = vmatprep.mubr.msk.f32.mxu1 %vm2437_vm0, %v2436_v0  ;;  %v1553_v24 = vld [vmem:[#allocation11 + $0x10] sm:$0xf] }
 0x1ce   :  { %2113 = vmatprep.subr.mxu1 %v2436_v0 }
 0x1cf   :  { %v671_v28 = vpop.permute.xlu0 %670 }
 0x1d0   :  { %2101 = vmatmul.mubr.msk.f32.vlgmr.msra.gmra.mxu0 %vm332_vm6, %v671_v28  ;;  %2106 = vmatmul.mubr.msk.f32.vlgmr.msra.gmra.mxu1 %vm162_vm2, %v750_v26  ;;  %v840_v28 = vlaneseq }
 0x1d1   :  { %2109 = vmatpush3.msk.msra.mxu0 %vm336_vm3, %v860_v27  ;;  %2110 = vmatprep.mubr.msk.f32.mxu0 %vm2437_vm0, %v2436_v0 }
 0x1d2   :  { %2114 = vmatpush3.msk.msra.mxu1 %vm336_vm3, %v858_v29  ;;  %2115 = vmatprep.mubr.msk.f32.mxu1 %vm2437_vm0, %v2436_v0  ;;  %v2701_v29 = vshrl.u32 %v840_v28, 7 }
 0x1d3   :  { %v862_v31 = vpop.permute.xlu0 %861  ;;  %2118 = vmatprep.subr.mxu0 %v2436_v0  ;;  %2123 = vmatprep.subr.mxu1 %v2436_v0 }
 0x1d4   :  { %2111 = vmatmul.mubr.msk.f32.vlgmr.msra.gmra.mxu0 %vm332_vm6, %v862_v31  ;;  %v834_v31 = vld [vmem:[#allocation13 + $0x8] sm:$0x3f] }
 0x1d5   :  { %2119 = vmatpush3.msk.msra.mxu0 %vm166_vm1, %v1016_v30  ;;  %2120 = vmatprep.mubr.msk.f32.mxu0 %vm2437_vm0, %v2436_v0  ;;  %v2704_v30 = vsub.s32 0, %v2701_v29 }
 0x1d6   :  { %2128 = vmatprep.subr.mxu0 %v2436_v0 }
 0x1d7   :  { %v939_v33 = vpop.permute.xlu0 %938 }
 0x1d8   :  { %2116 = vmatmul.mubr.msk.f32.vlgmr.msra.gmra.mxu1 %vm332_vm6, %v939_v33  ;;  %v843_v33 = vrot.slane %v834_v31, %v2704_v30 }
 0x1d9   :  { %2124 = vmatpush3.msk.msra.mxu1 %vm336_vm3, %v1128_v32  ;;  %2125 = vmatprep.mubr.msk.f32.mxu1 %vm2437_vm0, %v2436_v0  ;;  %v1370_v32 = vld [vmem:[#allocation13 + $0x10] sm:$0x3f] }
 0x1da   :  { %2133 = vmatprep.subr.mxu1 %v2436_v0 }
 0x1db   :  { %v1018_v35 = vpop.permute.xlu0 %1017 }
 0x1dc   :  { %2121 = vmatmul.mubr.msk.f32.vlgmr.msra.gmra.mxu0 %vm162_vm2, %v1018_v35  ;;  %v1994_v35 = vld [vmem:[#allocation14 + $0x1] ss:$0 sm:$0xff] }
 0x1dd   :  { %2129 = vmatpush3.msk.msra.mxu0 %vm336_vm3, %v1126_v34  ;;  %2130 = vmatprep.mubr.msk.f32.mxu0 %vm2437_vm0, %v2436_v0  ;;  %v1374_v34 = vrot.slane %v1370_v32, %v2704_v30 }
 0x1de   :  { %2138 = vmatprep.subr.mxu0 %v2436_v0 }
 0x1df   :  { %v1130_v37 = vpop.permute.xlu0 %1129 }
 0x1e0   :  { %2126 = vmatmul.mubr.msk.f32.vlgmr.msra.gmra.mxu1 %vm332_vm6, %v1130_v37 }
 0x1e1   :  { %2134 = vmatpush3.msk.msra.mxu1 %vm166_vm1, %v1284_v36  ;;  %2135 = vmatprep.mubr.msk.f32.mxu1 %vm2437_vm0, %v2436_v0  ;;  %v2010_v36 = vld [vmem:[#allocation14 + $0x2] ss:$0 sm:$0xff] }
 0x1e2   :  { %2143 = vmatprep.subr.mxu1 %v2436_v0 }
 0x1e3   :  { %v1207_v38 = vpop.permute.xlu0 %1206 }
 0x1e4   :  { %2131 = vmatmul.mubr.msk.f32.vlgmr.msra.gmra.mxu0 %vm332_vm6, %v1207_v38 }
 0x1e5   :  { %2140 = vmatprep.mubr.msk.f32.mxu0 %vm2437_vm0, %v2436_v0  ;;  %2139 = vmatpush3.msk.msra.mxu0 %vm336_vm3, %v1397_v55 }
 0x1e6   :  { %2148 = vmatprep.subr.mxu0 %v2436_v0 }
 0x1e7   :  { %v1286_v39 = vpop.permute.xlu0 %1285 }
 0x1e8   :  { %2136 = vmatmul.mubr.msk.f32.vlgmr.msra.gmra.mxu1 %vm162_vm2, %v1286_v39 }
 0x1e9   :  { %2145 = vmatprep.mubr.msk.f32.mxu1 %vm2437_vm0, %v2436_v0  ;;  %2144 = vmatpush3.msk.msra.mxu1 %vm336_vm3, %v1395_v56 }
 0x1ea   :  { %2153 = vmatprep.subr.mxu1 %v2436_v0 }
 0x1f4   :  { %v482_v40 = vpop.f32.mrf.mxu1 }
 0x1f6   :  { %v2087_v41 = vpop.f32.mrf.mxu1 }
 0x219   :  { %v406_v42 = vpop.f32.mrf.mxu0 }
 0x21a   :  { %v483_v44 = vadd.f32 %v482_v40, %v406_v42 }
 0x21b   :  { %v2082_v43 = vpop.f32.mrf.mxu0 }
 0x21d   :  { %v559_v45 = vpop.f32.mrf.mxu0 }
 0x21e   :  { %v563_v47 = vadd.f32 %v559_v45, %v483_v44  ;;  %v1995_v44 = vld [vmem:[%s2778_s12 + $0x1] ss:$0 sm:$0xff] }
 0x21f   :  { %v2092_v48 = vpop.f32.mrf.mxu0 }
 0x220   :  { %v569_v49 = vadd.f32 %v1985_v46, %v563_v47  ;;  %v2445_v48 = vmov 1  }
 0x221   :  { %2200 = vset.pattern.permute.xlu1 %v2445_v48 }
 0x222   :  { %v570_v51 = vmax.f32 %v569_v49, 0.0  ;;  %v1676_v49 = vld [vmem:[#allocation10 + $0xa] sm:$0x3] }
 0x224   :  { %v576_v52 = vmul.f32 %v1986_v50, %v570_v51  ;;  %v1674_v50 = vld [vmem:[#allocation8 + $0xa] sm:$0x3] }
 0x226   :  { %v578_v53 = vsel %vm577_vm7, %v576_v52, 0.0 }
 0x227   :  { %579 = vadd.xlane.f32.xlu1 %v578_v53 }
 0x238   :  { %1398 = vrot.lane.b32.xlu1 %v2603_v21, %s2442_s29 }
 0x23c   :  { %1475 = vrot.lane.b32.xlu1 %v2595_v17, %s2442_s29 }
 0x240   :  { %1554 = vrot.lane.b32.xlu1 %v2591_v16, %s2444_s15 }
 0x28c   :  { %v666_v57 = vpop.f32.mrf.mxu1 }
 0x28e   :  { %v2097_v58 = vpop.f32.mrf.mxu1 }
 0x290   :  { %v743_v59 = vpop.f32.mrf.mxu0  ;;  %v822_v60 = vpop.f32.mrf.mxu1 }
 0x291   :  { %v744_v61 = vadd.f32 %v743_v59, %v666_v57 }
 0x292   :  { %v2102_v62 = vpop.f32.mrf.mxu0  ;;  %v2107_v63 = vpop.f32.mrf.mxu1 }
 0x293   :  { %v826_v1 = vadd.f32 %v822_v60, %v744_v61  ;;  %v1102_v62 = vld [vmem:[#allocation13 + $0x18] sm:$0x3f] }
 0x294   :  { %v934_v2 = vpop.f32.mrf.mxu0 }
 0x295   :  { %v832_v38 = vadd.f32 %v1994_v35, %v826_v1 }
 0x296   :  { %v2112_v3 = vpop.f32.mrf.mxu0 }
 0x298   :  { %v1011_v4 = vpop.f32.mrf.mxu1 }
 0x299   :  { %v1012_v5 = vadd.f32 %v1011_v4, %v934_v2  ;;  %v2002_v2 = vld [vmem:[#allocation14 + $0x3] ss:$0 sm:$0xff] }
 0x29a   :  { %v2117_v6 = vpop.f32.mrf.mxu1 }
 0x29c   :  { %v1090_v7 = vpop.f32.mrf.mxu0 }
 0x29d   :  { %v2682_v8 = vadd.f32 %v1090_v7, %v1012_v5 }
 0x29e   :  { %v2122_v9 = vpop.f32.mrf.mxu0 }
 0x29f   :  { %v1100_v4 = vadd.f32 %v2002_v2, %v2682_v8 }
 0x2a0   :  { %v1202_v10 = vpop.f32.mrf.mxu1 }
 0x2a2   :  { %v2127_v11 = vpop.f32.mrf.mxu1 }
 0x2a4   :  { %v1279_v12 = vpop.f32.mrf.mxu0 }
 0x2a5   :  { %v1280_v13 = vadd.f32 %v1279_v12, %v1202_v10  ;;  %v2011_v10 = vld [vmem:[%s2778_s12 + $0x2] ss:$0 sm:$0xff] }
 0x2a6   :  { %v2132_v14 = vpop.f32.mrf.mxu0 }
 0x2a8   :  { %v1358_v15 = vpop.f32.mrf.mxu1 }
 0x2a9   :  { %v1362_v18 = vadd.f32 %v1358_v15, %v1280_v13 }
 0x2aa   :  { %v2137_v19 = vpop.f32.mrf.mxu1 }
 0x2ab   :  { %v1368_v39 = vadd.f32 %v2010_v36, %v1362_v18  ;;  %v2447_v18 = vmov 2   ;;  %v2448_v19 = vmov 3  }
 0x2b0   :  { %v580_v22 = vpop.xlane.xlu1 %579 }
 0x2b1   :  { %v2687_v23 = vadd.f32 %v2684_v20, %v580_v22  ;;  %v1832_v22 = vld [vmem:[#allocation11 + $0x14] sm:$0xf] }
 0x2b3   :  { %837 = vperm.xlu0 %2199, %v2687_v23  }
 0x2b4   :  { %v1399_v25 = vpop.permute.xlu1 %1398 }
 0x2b5   :  { %2141 = vmatmul.mubr.msk.f32.vlgmr.msra.gmra.mxu0 %vm332_vm6, %v1399_v25 }
 0x2b6   :  { %2149 = vmatpush3.msk.msra.mxu0 %vm166_vm1, %v1553_v24  ;;  %2150 = vmatprep.mubr.msk.f32.mxu0 %vm2437_vm0, %v2436_v0 }
 0x2b7   :  { %2158 = vmatprep.subr.mxu0 %v2436_v0  ;;  %2201 = vset.pattern.permute.xlu0 %v2447_v18 }
 0x2b8   :  { %v1476_v26 = vpop.permute.xlu1 %1475 }
 0x2b9   :  { %2146 = vmatmul.mubr.msk.f32.vlgmr.msra.gmra.mxu1 %vm332_vm6, %v1476_v26 }
 0x2ba   :  { %2155 = vmatprep.mubr.msk.f32.mxu1 %vm2437_vm0, %v2436_v0  ;;  %2154 = vmatpush3.msk.msra.mxu1 %vm336_vm3, %v1676_v49 }
 0x2bb   :  { %2163 = vmatprep.subr.mxu1 %v2436_v0 }
 0x2bc   :  { %v1555_v27 = vpop.permute.xlu1 %1554 }
 0x2bd   :  { %2151 = vmatmul.mubr.msk.f32.vlgmr.msra.gmra.mxu0 %vm162_vm2, %v1555_v27 }
 0x2be   :  { %2160 = vmatprep.mubr.msk.f32.mxu0 %vm2437_vm0, %v2436_v0  ;;  %2159 = vmatpush3.msk.msra.mxu0 %vm336_vm3, %v1674_v50 }
 0x32e   :  { %v2708_v37 = vpop.permute.xlu0 %837 }
 0x32f   :  { %v844_v40 = vmul.f32 %v843_v33, %v2708_v37  ;;  %v1375_v41 = vmul.f32 %v1374_v34, %v2708_v37 }
 0x331   :  { %v1376_v42 = vadd.f32 %v1375_v41, %v1368_v39  ;;  %v845_v43 = vadd.f32 %v844_v40, %v832_v38  ;;  %v1647_v39 = vsub.s32 2, %v2701_v29  ;;  %v1639_v40 = vld [vmem:[#allocation13 + $0x20] sm:$0x3f]  ;;  %v1658_v41 = vsub.s32 3, %v2701_v29 }
 0x333   :  { %v846_v45 = vmax.f32 %v845_v43, 0.0  ;;  %v2018_v43 = vld [vmem:[#allocation14 + $0x4] ss:$0 sm:$0xff] }
 0x335   :  { %v852_v46 = vmul.f32 %v1995_v44, %v846_v45  ;;  %v1659_v44 = vrot.slane %v1639_v40, %v1658_v41 }
 0x337   :  { %v853_v47 = vsel %vm577_vm7, %v852_v46, 0.0 }
 0x338   :  { %854 = vadd.xlane.f32.xlu0 %v853_v47 }
 0x34e   :  { %1677 = vrot.lane.b32.xlu0 %v2603_v21, %s2446_s16  ;;  %v1110_v21 = vsub.s32 1, %v2701_v29 }
 0x350   :  { %v1111_v63 = vrot.slane %v1102_v62, %v1110_v21  ;;  %v1380_v1 = vrot.slane %v1370_v32, %v1110_v21 }
 0x352   :  { %1754 = vrot.lane.b32.xlu0 %v2595_v17, %s2446_s16 }
 0x375   :  { %v1471_v51 = vpop.f32.mrf.mxu0 }
 0x377   :  { %v2142_v52 = vpop.f32.mrf.mxu0 }
 0x379   :  { %v1548_v53 = vpop.f32.mrf.mxu1 }
 0x37a   :  { %v1549_v54 = vadd.f32 %v1548_v53, %v1471_v51  ;;  %v2019_v51 = vld [vmem:[%s2778_s12 + $0x4] ss:$0 sm:$0xff] }
 0x37b   :  { %v2147_v55 = vpop.f32.mrf.mxu1 }
 0x37c   :  { %v2450_v55 = vmov 4  }
 0x37d   :  { %v1627_v56 = vpop.f32.mrf.mxu0 }
 0x37e   :  { %v2721_v57 = vadd.f32 %v1627_v56, %v1549_v54  ;;  %v1918_v56 = vld [vmem:[#allocation13 + $0x28] sm:$0x3f] }
 0x37f   :  { %v2152_v58 = vpop.f32.mrf.mxu0 }
 0x380   :  { %v1922_v58 = vrot.slane %v1918_v56, %v2704_v30 }
 0x3c1   :  { %v855_v59 = vpop.xlane.xlu0 %854 }
 0x3c2   :  { %v856_v60 = vadd.f32 %v2684_v20, %v855_v59  ;;  %v2026_v59 = vld [vmem:[#allocation14 + $0x5] ss:$0 sm:$0xff] }
 0x3c4   :  { %1105 = vperm.xlu1 %2200, %v856_v60   ;;  %v1948_v35 = vsel %vm1947_vm8, %v2687_v23, %v856_v60  ;;  %v1637_v23 = vadd.f32 %v2018_v43, %v2721_v57 }
 0x3c5   :  { %v1678_v61 = vpop.permute.xlu0 %1677 }
 0x3c6   :  { %2156 = vmatmul.mubr.msk.f32.vlgmr.msra.gmra.mxu1 %vm332_vm6, %v1678_v61 }
 0x3c7   :  { %2165 = vmatprep.mubr.msk.f32.mxu1 %vm2437_vm0, %v2436_v0  ;;  %v2003_v0 = vld [vmem:[%s2778_s12 + $0x3] ss:$0 sm:$0xff]  ;;  %2164 = vmatpush3.msk.msra.mxu1 %vm166_vm1, %v1832_v22 }
 0x3c8   :  { %2202 = vset.pattern.permute.xlu1 %v2448_v19 }
 0x3c9   :  { %v1755_v17 = vpop.permute.xlu0 %1754 }
 0x3ca   :  { %2161 = vmatmul.mubr.msk.f32.vlgmr.msra.gmra.mxu0 %vm332_vm6, %v1755_v17  ;;  %v1923_v17 = vmul.f32 %v1922_v58, %v2708_v37 }
 0x43f   :  { %v1106_v3 = vpop.permute.xlu1 %1105 }
 0x440   :  { %v1112_v5 = vmul.f32 %v1111_v63, %v1106_v3  ;;  %v1381_v6 = vmul.f32 %v1380_v1, %v1106_v3  ;;  %v1932_v3 = vsub.s32 4, %v2701_v29 }
 0x442   :  { %v1113_v7 = vadd.f32 %v1112_v5, %v1100_v4  ;;  %v1382_v9 = vadd.f32 %v1381_v6, %v1376_v42  ;;  %v1648_v42 = vrot.slane %v1639_v40, %v1647_v39  ;;  %v1933_v4 = vrot.slane %v1918_v56, %v1932_v3 }
 0x444   :  { %v1114_v11 = vmax.f32 %v1113_v7, 0.0  ;;  %v1383_v12 = vmax.f32 %v1382_v9, 0.0  ;;  %v2027_v7 = vld [vmem:[%s2778_s12 + $0x5] ss:$0 sm:$0xff] }
 0x446   :  { %v1120_v13 = vmul.f32 %v2003_v0, %v1114_v11  ;;  %v1389_v14 = vmul.f32 %v2011_v10, %v1383_v12 }
 0x448   :  { %v1121_v15 = vsel %vm577_vm7, %v1120_v13, 0.0  ;;  %v1390_v8 = vsel %vm577_vm7, %v1389_v14, 0.0 }
 0x449   :  { %1122 = vadd.xlane.f32.xlu0 %v1121_v15  ;;  %1391 = vadd.xlane.f32.xlu1 %v1390_v8 }
 0x45f   :  { %1833 = vrot.lane.b32.xlu0 %v2591_v16, %s2449_s23 }
 0x486   :  { %v1750_v24 = vpop.f32.mrf.mxu1 }
 0x488   :  { %v2157_v25 = vpop.f32.mrf.mxu1 }
 0x48a   :  { %v1827_v26 = vpop.f32.mrf.mxu0 }
 0x48b   :  { %v1828_v27 = vadd.f32 %v1827_v26, %v1750_v24 }
 0x48c   :  { %v2162_v28 = vpop.f32.mrf.mxu0 }
 0x4d2   :  { %v1123_v31 = vpop.xlane.xlu0 %1122  ;;  %v1392_v32 = vpop.xlane.xlu1 %1391 }
 0x4d3   :  { %v1124_v33 = vadd.f32 %v2684_v20, %v1123_v31  ;;  %v1393_v34 = vadd.f32 %v2684_v20, %v1392_v32 }
 0x4d5   :  { %v1949_v36 = vsel %vm332_vm6, %v1948_v35, %v1393_v34  ;;  %1653 = vperm.xlu1 %2202, %v1124_v33   ;;  %1642 = vperm.xlu0 %2201, %v1393_v34  }
 0x4d6   :  { %v1834_v38 = vpop.permute.xlu0 %1833  ;;  %v1950_v16 = vsel %vm251_vm5, %v1949_v36, %v1124_v33 }
 0x4d7   :  { %2166 = vmatmul.mubr.msk.f32.vlgmr.msra.gmra.mxu1 %vm162_vm2, %v1834_v38 }
 0x4d9   :  { %2203 = vset.pattern.permute.xlu1 %v2450_v55  ;;  %2204 = vset.pattern.permute.xlu0 %v2450_v55 }
 0x550   :  { %v1643_v45 = vpop.permute.xlu0 %1642  ;;  %v1654_v46 = vpop.permute.xlu1 %1653 }
 0x551   :  { %v1649_v47 = vmul.f32 %v1648_v42, %v1643_v45  ;;  %v1660_v49 = vmul.f32 %v1659_v44, %v1654_v46 }
 0x553   :  { %v1650_v48 = vadd.f32 %v1649_v47, %v1637_v23 }
 0x555   :  { %v1661_v50 = vadd.f32 %v1660_v49, %v1650_v48 }
 0x557   :  { %v1662_v52 = vmax.f32 %v1661_v50, 0.0 }
 0x559   :  { %v1668_v53 = vmul.f32 %v2019_v51, %v1662_v52 }
 0x55b   :  { %v1669_v54 = vsel %vm577_vm7, %v1668_v53, 0.0 }
 0x55c   :  { %1670 = vadd.xlane.f32.xlu0 %v1669_v54 }
 0x597   :  { %v1906_v57 = vpop.f32.mrf.mxu1 }
 0x598   :  { %v1910_v60 = vadd.f32 %v1906_v57, %v1828_v27 }
 0x599   :  { %v2167_v61 = vpop.f32.mrf.mxu1 }
 0x59a   :  { %v1916_v21 = vadd.f32 %v2026_v59, %v1910_v60 }
 0x59c   :  { %v1924_v62 = vadd.f32 %v1923_v17, %v1916_v21 }
 0x5e5   :  { %v1671_v63 = vpop.xlane.xlu0 %1670 }
 0x5e6   :  { %v1672_v1 = vadd.f32 %v2684_v20, %v1671_v63 }
 0x5e8   :  { %v1951_v2 = vsel %vm162_vm2, %v1950_v16, %v1672_v1  ;;  %1927 = vperm.xlu1 %2203, %v1672_v1  }
 0x663   :  { %v1928_v5 = vpop.permute.xlu1 %1927 }
 0x664   :  { %v1934_v6 = vmul.f32 %v1933_v4, %v1928_v5 }
 0x666   :  { %v1935_v30 = vadd.f32 %v1934_v6, %v1924_v62 }
 0x668   :  { %v1936_v9 = vmax.f32 %v1935_v30, 0.0 }
 0x66a   :  { %v1942_v37 = vmul.f32 %v2027_v7, %v1936_v9 }
 0x66c   :  { %v1943_v0 = vsel %vm577_vm7, %v1942_v37, 0.0 }
 0x66d   :  { %1944 = vadd.xlane.f32.xlu1 %v1943_v0 }
 0x6f6   :  { %v1945_v10 = vpop.xlane.xlu1 %1944 }
 0x6f7   :  { %v1946_v11 = vadd.f32 %v2684_v20, %v1945_v10 }
 0x6f9   :  { %v1953_v29 = vsel %vm1952_vm9, %v1951_v2, %v1946_v11 }
 0x6fa   :  { %1955 = vst.msk [vmem:[#allocation17] sm:$0x3] %vm1954_vm10, %v1953_v29 }
 0x6fb   :  { %2400 = shalt.err (!%p2397_p7)
}
 0x6fc   :  { %1965 = dma.vmem_to_hbm [thread:$0]  %s1963_s10, 32, %s2780_s14, [#allocation4]  }
 0x6fd   :  { %2419 = dma.done.wait [#allocation4], 32  }
 0x6fe   :  { %2420 = vsyncadd [#allocation4], 4294967264 }
 0x6ff   :  { %1969 = vsyncpa [#allocation3], 1 }
 0x700   :  { %1970 = vsyncpa [#allocation6], 1 }
 0x701   :  { %1971 = vsyncpa [#allocation9], 1 }
 0x702   :  { %1972 = vsyncpa [#allocation12], 1 }
 0x703   :  { %1973 = vsyncpa [#allocation15], 1 }
 0x704   :  { %1974 = vsyncpa [#allocation4], 1 }

</bundles_post_ra>
